<compile_context>
chip_gen: v7x
topology: tpu7x:2x2x1
jax: 0.10.0
libtpu: 0.0.40
codegen_flags: <defaults>
</compile_context>

<pallas_src>
import jax
import jax.numpy as jnp
from jax.experimental import pallas as pl
from jax.experimental.pallas import tpu as pltpu

B, L = 2, 16
BL = B * L
C_IN = 13
C1, C2, C3, C4 = 32, 64, 256, 12
N_OUT = 14


def net_kernel(x_ref,
               w1_ref, b1_ref, w2_ref, b2_ref, w3_ref, b3_ref,
               w4_ref, b4_ref, w5_ref, b5_ref,
               emma_ref, out_ref):
    x = x_ref[...]                                                  # (BL, 13) f32

    # Hoisted boundary masks (shared by all four convs; broadcast over lanes).
    row = jax.lax.broadcasted_iota(jnp.int32, (BL, 1), 0)
    pos = row % L                          # position within each batch element
    prev_ok = pos != 0                     # row t-1 belongs to the same element
    next_ok = pos != (L - 1)               # row t+1 belongs to the same element

    def conv(h, w_ref, b_ref):
        # h: (BL, Cin) f32; w_ref: (3*Cin, Cout) bf16; b_ref: (1, Cout) f32.
        # Conv1d(k=3, pad=1) as a single fused matmul over K = 3*Cin.
        h_prev = jnp.where(prev_ok, pltpu.roll(h, shift=1, axis=0), 0.0)
        h_next = jnp.where(next_ok, pltpu.roll(h, shift=BL - 1, axis=0), 0.0)
        h_cat = jnp.concatenate([h_prev, h, h_next], axis=-1)      # (BL, 3*Cin)
        w = w_ref[...].astype(jnp.float32)
        return jnp.dot(h_cat, w, preferred_element_type=jnp.float32) + b_ref[...]

    h1 = jnp.maximum(conv(x,  w1_ref, b1_ref), 0.0)                # (BL, 32)
    h2 = jnp.maximum(conv(h1, w2_ref, b2_ref), 0.0)                # (BL, 64)
    h3 = jnp.maximum(conv(h2, w3_ref, b3_ref), 0.0)                # (BL, 256)
    emma_ref[...] = conv(h3, w4_ref, b4_ref)                       # (BL, 12)

    # Head: full-M matmul first, then a tiny per-batch averaging matmul.
    s = jnp.dot(h3, w5_ref[...].astype(jnp.float32),
                preferred_element_type=jnp.float32)                # (BL, 14)
    r = jax.lax.broadcasted_iota(jnp.int32, (B, BL), 0)
    c = jax.lax.broadcasted_iota(jnp.int32, (B, BL), 1)
    in_batch = (c >= r * L) & (c < (r + 1) * L)
    mean_mat = jnp.where(in_batch, 1.0 / L, 0.0)                   # (B, BL)
    out_ref[...] = jnp.dot(mean_mat, s,
                           preferred_element_type=jnp.float32) + b5_ref[...]


@jax.jit
def net_forward(x, params):
    w1, b1, w2, b2, w3, b3, w4, b4, w5, b5 = params

    def flat(w):  # (3, Cin, Cout) -> (3*Cin, Cout); row-major, matches h_cat order
        k, cin, cout = w.shape
        return w.reshape(k * cin, cout)

    emma2d, out = pl.pallas_call(
        net_kernel,
        out_shape=(jax.ShapeDtypeStruct((BL, C4), jnp.float32),
                   jax.ShapeDtypeStruct((B, N_OUT), jnp.float32)),
    )(x.reshape(BL, C_IN),
      flat(w1), b1, flat(w2), b2, flat(w3), b3, flat(w4), b4, w5, b5)

    # emma corresponds to torch's emma.permute(0, 2, 1) -> (B, L, 12)
    return emma2d.reshape(B, L, C4), out


def ref_forward(x, params):
    # Pure-JAX reference (weights up-cast to f32, HIGHEST precision matmuls).
    w1, b1, w2, b2, w3, b3, w4, b4, w5, b5 = [p.astype(jnp.float32) for p in params]
    hi = jax.lax.Precision.HIGHEST

    def conv(h, w, b):
        hp = jnp.pad(h, ((0, 0), (1, 1), (0, 0)))
        y = sum(jnp.einsum('blc,cd->bld', hp[:, k:k + L, :], w[k], precision=hi)
                for k in range(3))
        return y + b

    h1 = jax.nn.relu(conv(x, w1, b1))
    h2 = jax.nn.relu(conv(h1, w2, b2))
    h3 = jax.nn.relu(conv(h2, w3, b3))
    emma = conv(h3, w4, b4)
    out = jnp.dot(jnp.mean(h3, axis=1), w5, precision=hi) + b5
    return emma, out


def make_params(key):
    ks = jax.random.split(key, 10)

    def rnd(k, shape, dtype=jnp.float32, scale=0.05):
        return (jax.random.normal(k, shape, jnp.float32) * scale).astype(dtype)

    # Conv weights stored as (k=3, Cin, Cout) (transpose of torch (Cout, Cin, k));
    # Linear weight stored as (in, out).  Weights ship as bf16, biases stay f32.
    w1 = rnd(ks[0], (3, C_IN, C1), jnp.bfloat16); b1 = rnd(ks[1], (1, C1))
    w2 = rnd(ks[2], (3, C1, C2), jnp.bfloat16);   b2 = rnd(ks[3], (1, C2))
    w3 = rnd(ks[4], (3, C2, C3), jnp.bfloat16);   b3 = rnd(ks[5], (1, C3))
    w4 = rnd(ks[6], (3, C3, C4), jnp.bfloat16);   b4 = rnd(ks[7], (1, C4))
    w5 = rnd(ks[8], (C3, N_OUT), jnp.bfloat16);   b5 = rnd(ks[9], (1, N_OUT))
    return (w1, b1, w2, b2, w3, b3, w4, b4, w5, b5)


if __name__ == "__main__":
    key = jax.random.PRNGKey(0)
    pkey, xkey = jax.random.split(key)
    params = make_params(pkey)
    x = jax.random.normal(xkey, (B, L, C_IN), jnp.float32)

    emma, out = net_forward(x, params)
    jax.block_until_ready((emma, out))

    emma_ref, out_ref = ref_forward(x, params)
    assert emma.shape == (B, L, C4) and out.shape == (B, N_OUT)
    assert bool(jnp.allclose(emma, emma_ref, rtol=2e-2, atol=2e-3)), "emma mismatch"
    assert bool(jnp.allclose(out, out_ref, rtol=2e-2, atol=2e-3)), "out mismatch"

    print("KERNEL_OK")
</pallas_src>

<mosaic_0001>
module attributes {stable_mosaic.version = 11 : i64} {
  func.func @net_kernel(%arg0: memref<32x13xf32, #tpu.memory_space<vmem>>, %arg1: memref<39x32xbf16, #tpu.memory_space<vmem>>, %arg2: memref<1x32xf32, #tpu.memory_space<vmem>>, %arg3: memref<96x64xbf16, #tpu.memory_space<vmem>>, %arg4: memref<1x64xf32, #tpu.memory_space<vmem>>, %arg5: memref<192x256xbf16, #tpu.memory_space<vmem>>, %arg6: memref<1x256xf32, #tpu.memory_space<vmem>>, %arg7: memref<768x12xbf16, #tpu.memory_space<vmem>>, %arg8: memref<1x12xf32, #tpu.memory_space<vmem>>, %arg9: memref<256x14xbf16, #tpu.memory_space<vmem>>, %arg10: memref<1x14xf32, #tpu.memory_space<vmem>>, %arg11: memref<32x12xf32, #tpu.memory_space<vmem>>, %arg12: memref<2x14xf32, #tpu.memory_space<vmem>>) attributes {dimension_semantics = [], scalar_prefetch = 0 : i64, scratch_operands = 0 : i64, tpu.core_type = #tpu.core_type<tc>} {
    %c0 = arith.constant 0 : index
    %c0_0 = arith.constant 0 : index
    %0 = vector.load %arg0[%c0, %c0_0] : memref<32x13xf32, #tpu.memory_space<vmem>>, vector<32x13xf32>
    %1 = tpu.iota {dimensions = array<i32: 0>} : vector<32x1xi32>
    %c16_i32 = arith.constant 16 : i32
    %c0_i32 = arith.constant 0 : i32
    %2 = arith.cmpi eq, %c16_i32, %c0_i32 : i32
    %c1_i32 = arith.constant 1 : i32
    %3 = arith.select %2, %c1_i32, %c16_i32 : i32
    %4 = vector.broadcast %3 : i32 to vector<32x1xi32>
    %5 = arith.remsi %1, %4 : vector<32x1xi32>
    %c0_i32_1 = arith.constant 0 : i32
    %6 = vector.broadcast %c0_i32_1 : i32 to vector<32x1xi32>
    %7 = arith.cmpi ne, %5, %6 : vector<32x1xi32>
    %c0_i32_2 = arith.constant 0 : i32
    %8 = vector.broadcast %c0_i32_2 : i32 to vector<32x1xi32>
    %9 = arith.cmpi slt, %5, %8 : vector<32x1xi32>
    %c0_i32_3 = arith.constant 0 : i32
    %10 = arith.cmpi slt, %3, %c0_i32_3 : i32
    %11 = vector.broadcast %10 : i1 to vector<32x1xi1>
    %12 = vector.broadcast %11 : vector<32x1xi1> to vector<32x1xi1>
    %13 = arith.xori %9, %12 : vector<32x1xi1>
    %14 = arith.andi %13, %7 : vector<32x1xi1>
    %15 = vector.broadcast %3 : i32 to vector<32x1xi32>
    %16 = arith.addi %5, %15 : vector<32x1xi32>
    %17 = arith.select %14, %16, %5 : vector<32x1xi1>, vector<32x1xi32>
    %c0_i32_4 = arith.constant 0 : i32
    %18 = vector.broadcast %c0_i32_4 : i32 to vector<32x1xi32>
    %19 = arith.cmpi ne, %17, %18 : vector<32x1xi32>
    %c15_i32 = arith.constant 15 : i32
    %20 = vector.broadcast %c15_i32 : i32 to vector<32x1xi32>
    %21 = arith.cmpi ne, %17, %20 : vector<32x1xi32>
    %c1_i32_5 = arith.constant 1 : i32
    %22 = tpu.dynamic_rotate %0 by %c1_i32_5 dim 0 : vector<32x13xf32>, i32 -> vector<32x13xf32>
    %cst = arith.constant 0.000000e+00 : f32
    %23 = vector.shape_cast %19 : vector<32x1xi1> to vector<32x1xi1>
    %24 = vector.broadcast %23 : vector<32x1xi1> to vector<32x13xi1>
    %25 = vector.broadcast %cst : f32 to vector<32x13xf32>
    %26 = arith.select %24, %22, %25 : vector<32x13xi1>, vector<32x13xf32>
    %c31_i32 = arith.constant 31 : i32
    %27 = tpu.dynamic_rotate %0 by %c31_i32 dim 0 : vector<32x13xf32>, i32 -> vector<32x13xf32>
    %cst_6 = arith.constant 0.000000e+00 : f32
    %28 = vector.shape_cast %21 : vector<32x1xi1> to vector<32x1xi1>
    %29 = vector.broadcast %28 : vector<32x1xi1> to vector<32x13xi1>
    %30 = vector.broadcast %cst_6 : f32 to vector<32x13xf32>
    %31 = arith.select %29, %27, %30 : vector<32x13xi1>, vector<32x13xf32>
    %32 = tpu.concatenate %26, %0, %31 in 1 : vector<32x13xf32>, vector<32x13xf32>, vector<32x13xf32> -> vector<32x39xf32>
    %c0_7 = arith.constant 0 : index
    %c0_8 = arith.constant 0 : index
    %33 = vector.load %arg1[%c0_7, %c0_8] : memref<39x32xbf16, #tpu.memory_space<vmem>>, vector<39x32xbf16>
    %34 = arith.extf %33 : vector<39x32xbf16> to vector<39x32xf32>
    %cst_9 = arith.constant dense<0.000000e+00> : vector<32x32xf32>
    %35 = tpu.matmul %32, %34, %cst_9 {dimension_numbers = #tpu.dot_dimension_numbers<[1], [0], [0], [1], [0, 0, 1, 1], [], []>} : vector<32x39xf32>, vector<39x32xf32>, vector<32x32xf32> -> vector<32x32xf32>
    %c0_10 = arith.constant 0 : index
    %c0_11 = arith.constant 0 : index
    %36 = vector.load %arg2[%c0_10, %c0_11] : memref<1x32xf32, #tpu.memory_space<vmem>>, vector<1x32xf32>
    %37 = vector.broadcast %36 : vector<1x32xf32> to vector<32x32xf32>
    %38 = arith.addf %35, %37 : vector<32x32xf32>
    %cst_12 = arith.constant 0.000000e+00 : f32
    %39 = vector.broadcast %cst_12 : f32 to vector<32x32xf32>
    %40 = arith.maximumf %38, %39 : vector<32x32xf32>
    %c1_i32_13 = arith.constant 1 : i32
    %41 = tpu.dynamic_rotate %40 by %c1_i32_13 dim 0 : vector<32x32xf32>, i32 -> vector<32x32xf32>
    %cst_14 = arith.constant 0.000000e+00 : f32
    %42 = vector.shape_cast %19 : vector<32x1xi1> to vector<32x1xi1>
    %43 = vector.broadcast %42 : vector<32x1xi1> to vector<32x32xi1>
    %44 = vector.broadcast %cst_14 : f32 to vector<32x32xf32>
    %45 = arith.select %43, %41, %44 : vector<32x32xi1>, vector<32x32xf32>
    %c31_i32_15 = arith.constant 31 : i32
    %46 = tpu.dynamic_rotate %40 by %c31_i32_15 dim 0 : vector<32x32xf32>, i32 -> vector<32x32xf32>
    %cst_16 = arith.constant 0.000000e+00 : f32
    %47 = vector.shape_cast %21 : vector<32x1xi1> to vector<32x1xi1>
    %48 = vector.broadcast %47 : vector<32x1xi1> to vector<32x32xi1>
    %49 = vector.broadcast %cst_16 : f32 to vector<32x32xf32>
    %50 = arith.select %48, %46, %49 : vector<32x32xi1>, vector<32x32xf32>
    %51 = tpu.concatenate %45, %40, %50 in 1 : vector<32x32xf32>, vector<32x32xf32>, vector<32x32xf32> -> vector<32x96xf32>
    %c0_17 = arith.constant 0 : index
    %c0_18 = arith.constant 0 : index
    %52 = vector.load %arg3[%c0_17, %c0_18] : memref<96x64xbf16, #tpu.memory_space<vmem>>, vector<96x64xbf16>
    %53 = arith.extf %52 : vector<96x64xbf16> to vector<96x64xf32>
    %cst_19 = arith.constant dense<0.000000e+00> : vector<32x64xf32>
    %54 = tpu.matmul %51, %53, %cst_19 {dimension_numbers = #tpu.dot_dimension_numbers<[1], [0], [0], [1], [0, 0, 1, 1], [], []>} : vector<32x96xf32>, vector<96x64xf32>, vector<32x64xf32> -> vector<32x64xf32>
    %c0_20 = arith.constant 0 : index
    %c0_21 = arith.constant 0 : index
    %55 = vector.load %arg4[%c0_20, %c0_21] : memref<1x64xf32, #tpu.memory_space<vmem>>, vector<1x64xf32>
    %56 = vector.broadcast %55 : vector<1x64xf32> to vector<32x64xf32>
    %57 = arith.addf %54, %56 : vector<32x64xf32>
    %cst_22 = arith.constant 0.000000e+00 : f32
    %58 = vector.broadcast %cst_22 : f32 to vector<32x64xf32>
    %59 = arith.maximumf %57, %58 : vector<32x64xf32>
    %c1_i32_23 = arith.constant 1 : i32
    %60 = tpu.dynamic_rotate %59 by %c1_i32_23 dim 0 : vector<32x64xf32>, i32 -> vector<32x64xf32>
    %cst_24 = arith.constant 0.000000e+00 : f32
    %61 = vector.shape_cast %19 : vector<32x1xi1> to vector<32x1xi1>
    %62 = vector.broadcast %61 : vector<32x1xi1> to vector<32x64xi1>
    %63 = vector.broadcast %cst_24 : f32 to vector<32x64xf32>
    %64 = arith.select %62, %60, %63 : vector<32x64xi1>, vector<32x64xf32>
    %c31_i32_25 = arith.constant 31 : i32
    %65 = tpu.dynamic_rotate %59 by %c31_i32_25 dim 0 : vector<32x64xf32>, i32 -> vector<32x64xf32>
    %cst_26 = arith.constant 0.000000e+00 : f32
    %66 = vector.shape_cast %21 : vector<32x1xi1> to vector<32x1xi1>
    %67 = vector.broadcast %66 : vector<32x1xi1> to vector<32x64xi1>
    %68 = vector.broadcast %cst_26 : f32 to vector<32x64xf32>
    %69 = arith.select %67, %65, %68 : vector<32x64xi1>, vector<32x64xf32>
    %70 = tpu.concatenate %64, %59, %69 in 1 : vector<32x64xf32>, vector<32x64xf32>, vector<32x64xf32> -> vector<32x192xf32>
    %c0_27 = arith.constant 0 : index
    %c0_28 = arith.constant 0 : index
    %71 = vector.load %arg5[%c0_27, %c0_28] : memref<192x256xbf16, #tpu.memory_space<vmem>>, vector<192x256xbf16>
    %72 = arith.extf %71 : vector<192x256xbf16> to vector<192x256xf32>
    %cst_29 = arith.constant dense<0.000000e+00> : vector<32x256xf32>
    %73 = tpu.matmul %70, %72, %cst_29 {dimension_numbers = #tpu.dot_dimension_numbers<[1], [0], [0], [1], [0, 0, 1, 1], [], []>} : vector<32x192xf32>, vector<192x256xf32>, vector<32x256xf32> -> vector<32x256xf32>
    %c0_30 = arith.constant 0 : index
    %c0_31 = arith.constant 0 : index
    %74 = vector.load %arg6[%c0_30, %c0_31] : memref<1x256xf32, #tpu.memory_space<vmem>>, vector<1x256xf32>
    %75 = vector.broadcast %74 : vector<1x256xf32> to vector<32x256xf32>
    %76 = arith.addf %73, %75 : vector<32x256xf32>
    %cst_32 = arith.constant 0.000000e+00 : f32
    %77 = vector.broadcast %cst_32 : f32 to vector<32x256xf32>
    %78 = arith.maximumf %76, %77 : vector<32x256xf32>
    %c1_i32_33 = arith.constant 1 : i32
    %79 = tpu.dynamic_rotate %78 by %c1_i32_33 dim 0 : vector<32x256xf32>, i32 -> vector<32x256xf32>
    %cst_34 = arith.constant 0.000000e+00 : f32
    %80 = vector.shape_cast %19 : vector<32x1xi1> to vector<32x1xi1>
    %81 = vector.broadcast %80 : vector<32x1xi1> to vector<32x256xi1>
    %82 = vector.broadcast %cst_34 : f32 to vector<32x256xf32>
    %83 = arith.select %81, %79, %82 : vector<32x256xi1>, vector<32x256xf32>
    %c31_i32_35 = arith.constant 31 : i32
    %84 = tpu.dynamic_rotate %78 by %c31_i32_35 dim 0 : vector<32x256xf32>, i32 -> vector<32x256xf32>
    %cst_36 = arith.constant 0.000000e+00 : f32
    %85 = vector.shape_cast %21 : vector<32x1xi1> to vector<32x1xi1>
    %86 = vector.broadcast %85 : vector<32x1xi1> to vector<32x256xi1>
    %87 = vector.broadcast %cst_36 : f32 to vector<32x256xf32>
    %88 = arith.select %86, %84, %87 : vector<32x256xi1>, vector<32x256xf32>
    %89 = tpu.concatenate %83, %78, %88 in 1 : vector<32x256xf32>, vector<32x256xf32>, vector<32x256xf32> -> vector<32x768xf32>
    %c0_37 = arith.constant 0 : index
    %c0_38 = arith.constant 0 : index
    %90 = vector.load %arg7[%c0_37, %c0_38] : memref<768x12xbf16, #tpu.memory_space<vmem>>, vector<768x12xbf16>
    %91 = arith.extf %90 : vector<768x12xbf16> to vector<768x12xf32>
    %cst_39 = arith.constant dense<0.000000e+00> : vector<32x12xf32>
    %92 = tpu.matmul %89, %91, %cst_39 {dimension_numbers = #tpu.dot_dimension_numbers<[1], [0], [0], [1], [0, 0, 1, 1], [], []>} : vector<32x768xf32>, vector<768x12xf32>, vector<32x12xf32> -> vector<32x12xf32>
    %c0_40 = arith.constant 0 : index
    %c0_41 = arith.constant 0 : index
    %93 = vector.load %arg8[%c0_40, %c0_41] : memref<1x12xf32, #tpu.memory_space<vmem>>, vector<1x12xf32>
    %94 = vector.broadcast %93 : vector<1x12xf32> to vector<32x12xf32>
    %95 = arith.addf %92, %94 : vector<32x12xf32>
    %c0_42 = arith.constant 0 : index
    %c0_43 = arith.constant 0 : index
    %96 = vector.load %arg11[%c0_42, %c0_43] : memref<32x12xf32, #tpu.memory_space<vmem>>, vector<32x12xf32>
    tpu.vector_store %arg11[%c0_42, %c0_43], %95 {strides = array<i32>} : memref<32x12xf32, #tpu.memory_space<vmem>>, vector<32x12xf32>,
    %c0_44 = arith.constant 0 : index
    %c0_45 = arith.constant 0 : index
    %97 = vector.load %arg9[%c0_44, %c0_45] : memref<256x14xbf16, #tpu.memory_space<vmem>>, vector<256x14xbf16>
    %98 = arith.extf %97 : vector<256x14xbf16> to vector<256x14xf32>
    %cst_46 = arith.constant dense<0.000000e+00> : vector<32x14xf32>
    %99 = tpu.matmul %78, %98, %cst_46 {dimension_numbers = #tpu.dot_dimension_numbers<[1], [0], [0], [1], [0, 0, 1, 1], [], []>} : vector<32x256xf32>, vector<256x14xf32>, vector<32x14xf32> -> vector<32x14xf32>
    %100 = tpu.iota {dimensions = array<i32: 0>} : vector<2x32xi32>
    %101 = tpu.iota {dimensions = array<i32: 1>} : vector<2x32xi32>
    %c16_i32_47 = arith.constant 16 : i32
    %102 = vector.broadcast %c16_i32_47 : i32 to vector<2x32xi32>
    %103 = arith.muli %100, %102 : vector<2x32xi32>
    %104 = arith.cmpi sge, %101, %103 : vector<2x32xi32>
    %c1_i32_48 = arith.constant 1 : i32
    %105 = vector.broadcast %c1_i32_48 : i32 to vector<2x32xi32>
    %106 = arith.addi %100, %105 : vector<2x32xi32>
    %c16_i32_49 = arith.constant 16 : i32
    %107 = vector.broadcast %c16_i32_49 : i32 to vector<2x32xi32>
    %108 = arith.muli %106, %107 : vector<2x32xi32>
    %109 = arith.cmpi slt, %101, %108 : vector<2x32xi32>
    %110 = arith.andi %104, %109 : vector<2x32xi1>
    %cst_50 = arith.constant 6.250000e-02 : f32
    %cst_51 = arith.constant 0.000000e+00 : f32
    %111 = vector.broadcast %cst_50 : f32 to vector<2x32xf32>
    %112 = vector.broadcast %cst_51 : f32 to vector<2x32xf32>
    %113 = arith.select %110, %111, %112 : vector<2x32xi1>, vector<2x32xf32>
    %cst_52 = arith.constant dense<0.000000e+00> : vector<2x14xf32>
    %114 = tpu.matmul %113, %99, %cst_52 {dimension_numbers = #tpu.dot_dimension_numbers<[1], [0], [0], [1], [0, 0, 1, 1], [], []>} : vector<2x32xf32>, vector<32x14xf32>, vector<2x14xf32> -> vector<2x14xf32>
    %c0_53 = arith.constant 0 : index
    %c0_54 = arith.constant 0 : index
    %115 = vector.load %arg10[%c0_53, %c0_54] : memref<1x14xf32, #tpu.memory_space<vmem>>, vector<1x14xf32>
    %116 = vector.broadcast %115 : vector<1x14xf32> to vector<2x14xf32>
    %117 = arith.addf %114, %116 : vector<2x14xf32>
    %c0_55 = arith.constant 0 : index
    %c0_56 = arith.constant 0 : index
    %118 = vector.load %arg12[%c0_55, %c0_56] : memref<2x14xf32, #tpu.memory_space<vmem>>, vector<2x14xf32>
    tpu.vector_store %arg12[%c0_55, %c0_56], %117 {strides = array<i32>} : memref<2x14xf32, #tpu.memory_space<vmem>>, vector<2x14xf32>,
    return
  }
}

</mosaic_0001>

<bundles_post_ra>
// kernel: net_forward.1
= control target key start
LH: loop header
LB: loop body
LE: loop exit
PB: predicated region body
PF: predicated region fallthrough
CT: control target
= control target key end

     0   :  { %v45_v3 = vlaneseq  ;;  %s2465_s27 = smov 13   ;;  %s2466_s17 = smov 26   ;;  %vm220_vm2 = vcmask 1046528   ;;  %s3131_s0 = inlined_call_operand.vmem [shape: f32[32,13], index: 0, kind: input, shape index: {}]   ;;  %s3132_s1 = inlined_call_operand.vmem [shape: bf16[39,32], index: 1, kind: input, shape index: {}]   ;;  %s3133_s2 = inlined_call_operand.vmem [shape: f32[1,32], index: 2, kind: input, shape index: {}]   ;;  %s3134_s3 = inlined_call_operand.vmem [shape: bf16[96,64], index: 3, kind: input, shape index: {}]   ;;  %s3135_s4 = inlined_call_operand.vmem [shape: f32[1,64], index: 4, kind: input, shape index: {}]   ;;  %s3136_s5 = inlined_call_operand.vmem [shape: bf16[192,256], index: 5, kind: input, shape index: {}]   ;;  %s3137_s6 = inlined_call_operand.vmem [shape: f32[1,256], index: 6, kind: input, shape index: {}]   ;;  %s3138_s7 = inlined_call_operand.vmem [shape: bf16[768,12], index: 7, kind: input, shape index: {}]   ;;  %s3139_s8 = inlined_call_operand.vmem [shape: f32[1,12], index: 8, kind: input, shape index: {}]   ;;  %s3140_s9 = inlined_call_operand.vmem [shape: bf16[256,14], index: 9, kind: input, shape index: {}]   ;;  %s3141_s10 = inlined_call_operand.vmem [shape: f32[1,14], index: 10, kind: input, shape index: {}]   ;;  %s3142_s11 = inlined_call_operand.vmem [shape: f32[32,12], index: 11, kind: output, shape index: {0}]   ;;  %s3143_s12 = inlined_call_operand.hbm [shape: f32[2,14], index: 12, kind: output, shape index: {1}]  }
   0x1   :  { %v41_v0 = vld [vmem:[%s3131_s0] sm:$0xff]  ;;  %v44_v1 = vld [vmem:[%s3131_s0 + $0x18] sm:$0xff]  ;;  %v42_v2 = vld [vmem:[%s3131_s0 + $0x8] sm:$0xff] }
   0x2   :  { %152 = vrot.lane.b32.xlu0 %v41_v0, %s2465_s27  ;;  %v127_v4 = vrot.slane %v41_v0, 1  ;;  %158 = vrot.lane.b32.xlu1 %v44_v1, %s2465_s27  ;;  %v43_v5 = vld [vmem:[%s3131_s0 + $0x10] sm:$0xff]  ;;  %v1541_v6 = vld [vmem:[%s3132_s1] sm:$0xff]   ;;  %v106_v7 = vrot.slane %v41_v0, 7  ;;  %v128_v8 = vrot.slane %v42_v2, 1  ;;  %v2556_v9 = vshrl.u32 %v45_v3, 7 }
   0x3   :  { %2160 = vmatprep.subr.bf16.mxu1 %v1541_v6  ;;  %v1828_v10 = vld [vmem:[%s3132_s1 + $0x8] sm:$0xff]   ;;  %v109_v11 = vrot.slane %v44_v1, 7  ;;  %v107_v12 = vrot.slane %v42_v2, 7  ;;  %v108_v13 = vrot.slane %v43_v5, 7  ;;  %v129_v14 = vrot.slane %v43_v5, 1 }
   0x4   :  { %2162 = vmatpush3.bf16.msra.mxu1 %v1541_v6  ;;  %v130_v15 = vrot.slane %v44_v1, 1  ;;  %vm131_vm0 = vcmp.lt.s32.totalorder %v2556_v9, 7  ;;  %v47_v16 = vadd.s32 8, %v2556_v9  ;;  %v49_v17 = vadd.s32 24, %v2556_v9  ;;  %v194_v18 = vld [vmem:[%s3132_s1 + $0x10] sm:$0xf] }
   0x5   :  { %2164 = vmatprep.subr.bf16.mxu1 %v1828_v10  ;;  %v134_v19 = vsel %vm131_vm0, %v127_v4, %v128_v8  ;;  %v133_v21 = vsel %vm131_vm0, %v128_v8, %v129_v14  ;;  %vm110_vm1 = vcmp.lt.s32.totalorder %v2556_v9, 1  ;;  %v199_v31 = vunpack.c.l.bf16 %v194_v18 }
   0x6   :  { %154 = vrot.lane.b32.xlu0 %v42_v2, %s2465_s27  ;;  %168 = vrot.lane.b32.xlu1 %v134_v19, %s2466_s17  ;;  %v61_v20 = vand.u32 15, %v47_v16  ;;  %v75_v22 = vand.u32 15, %v49_v17  ;;  %v114_v23 = vsel %vm110_vm1, %v109_v11, %v106_v7  ;;  %v111_v24 = vsel %vm110_vm1, %v108_v13, %v109_v11 }
   0x7   :  { %v113_v25 = vsel %vm110_vm1, %v106_v7, %v107_v12  ;;  %v135_v28 = vsel %vm131_vm0, %v130_v15, %v127_v4  ;;  %v112_v29 = vsel %vm110_vm1, %v107_v12, %v108_v13  ;;  %v132_v32 = vsel %vm131_vm0, %v129_v14, %v130_v15 }
   0x8   :  { %2166 = vmatpush3.bf16.msra.mxu1 %v1828_v10  ;;  %vm2579_vm3 = vcmp.ne.s32.totalorder %v61_v20, 15  ;;  %vm2583_vm4 = vcmp.ne.s32.totalorder %v75_v22, 15 }
   0x9   :  { %v145_v30 = vsel %vm2579_vm3, %v133_v21, 0.0  ;;  %v147_v33 = vsel %vm2583_vm4, %v135_v28, 0.0  ;;  %2110 = vmatprep.subr.msk.mxu1 %vm220_vm2, %v199_v31 }
   0xa   :  { %156 = vrot.lane.b32.xlu0 %v43_v5, %s2465_s27  ;;  %170 = vrot.lane.b32.xlu1 %v145_v30, %s2466_s17 }
   0xc   :  { %2111 = vmatpush3.msk.msra.mxu1 %vm220_vm2, %v199_v31 }
   0xd   :  { %18 = vsyncpa [#allocation3], 0  ;;  %v54_v34 = vand.u32 15, %v2556_v9  ;;  %v48_v35 = vadd.s32 16, %v2556_v9  ;;  %vm180_vm6 = vcmask 105472   ;;  %vm185_vm7 = vcmask 211968  }
   0xe   :  { %172 = vrot.lane.b32.xlu0 %v132_v32, %s2466_s17  ;;  %174 = vrot.lane.b32.xlu1 %v147_v33, %s2466_s17  ;;  %vm207_vm8 = vcmask 318464   ;;  %v1549_v57 = vld [vmem:[%s3134_s3] sm:$0xff]   ;;  %v1829_v58 = vld [vmem:[%s3134_s3 + $0x8] sm:$0xff]   ;;  %s2467_s13 = smov 32   ;;  %vm369_vm10 = vcmask 261120   ;;  %vm374_vm11 = vcmask 523264  }
   0xf   :  { %vm2600_vm5 = vcmp.ne.s32.totalorder %v54_v34, 0  ;;  %v68_v40 = vand.u32 15, %v48_v35  ;;  %2168 = vmatprep.subr.bf16.mxu0 %v1549_v57  ;;  %v1830_v59 = vld [vmem:[%s3134_s3 + $0x10] sm:$0xff]   ;;  %v1831_v60 = vld [vmem:[%s3134_s3 + $0x18] sm:$0xff]   ;;  %v1832_v61 = vld [vmem:[%s3134_s3 + $0x20] sm:$0xff]   ;;  %vm410_vm12 = vcmask 785408  }
  0x10   :  { %v123_v39 = vsel %vm2600_vm5, %v114_v23, 0.0  ;;  %2170 = vmatpush3.bf16.msra.mxu0 %v1549_v57  ;;  %v1833_v62 = vld [vmem:[%s3134_s3 + $0x28] sm:$0xff]   ;;  %v1514_v63 = vld [vmem:[%s3133_s2] ss:$0 sm:$0xff]  ;;  %s2468_s2 = smov 64   ;;  %v1860_v27 = vld [vmem:[%s3138_s7 + $0xd8] sm:$0xff]  }
  0x11   :  { %vm2608_vm9 = vcmp.ne.s32.totalorder %v68_v40, 0  ;;  %2172 = vmatprep.subr.bf16.mxu0 %v1829_v58  ;;  %v2410_v57 = vld [vmem:[%s3136_s5 + $0x10] ss:$8 sps:$4 sm:$0xff]   ;;  %v1849_v26 = vld [vmem:[%s3138_s7 + $0x80] sm:$0xff]   ;;  %v1850_v36 = vld [vmem:[%s3138_s7 + $0x88] sm:$0xff]   ;;  %vm2470_vm13 = vmmov 0  }
  0x12   :  { %v125_v48 = vsel %vm2608_vm9, %v112_v29, 0.0  ;;  %v1853_v45 = vld [vmem:[%s3138_s7 + $0xa0] sm:$0xff]   ;;  %vm1251_vm14 = vcmask 97280   ;;  %vm1494_vm2 = vcmask 107520  }
  0x14   :  { %2174 = vmatpush3.bf16.msra.mxu0 %v1829_v58  ;;  %v2411_v58 = vld [vmem:[%s3136_s5 + $0x24] ss:$8 sps:$4 sm:$0xff]  }
  0x15   :  { %2176 = vmatprep.subr.bf16.mxu0 %v1830_v59 }
  0x18   :  { %2178 = vmatpush3.bf16.msra.mxu0 %v1830_v59  ;;  %v2413_v59 = vld [vmem:[%s3136_s5 + $0x20] ss:$8 sps:$4 sm:$0xff]  }
  0x19   :  { %2180 = vmatprep.subr.bf16.mxu0 %v1831_v60 }
  0x1c   :  { %2182 = vmatpush3.bf16.msra.mxu0 %v1831_v60  ;;  %v2414_v60 = vld [vmem:[%s3136_s5 + $0x34] ss:$8 sps:$4 sm:$0xff]  }
  0x1d   :  { %2184 = vmatprep.subr.bf16.mxu0 %v1832_v61 }
  0x20   :  { %2186 = vmatpush3.bf16.msra.mxu0 %v1832_v61  ;;  %v2416_v61 = vld [vmem:[%s3136_s5 + $0x30] ss:$8 sps:$4 sm:$0xff]  }
  0x21   :  { %2188 = vmatprep.subr.bf16.mxu0 %v1833_v62 }
  0x24   :  { %2190 = vmatpush3.bf16.msra.mxu0 %v1833_v62  ;;  %v2417_v62 = vld [vmem:[%s3136_s5 + $0x44] ss:$8 sps:$4 sm:$0xff]  }
  0x74   :  { %v153_v37 = vpop.permute.xlu0 %152  ;;  %v159_v38 = vpop.permute.xlu1 %158 }
  0x75   :  { %v181_v42 = vsel %vm180_vm6, %v123_v39, %v153_v37  ;;  %v184_v53 = vsel %vm180_vm6, %v111_v24, %v159_v38 }
  0x78   :  { %v155_v41 = vpop.permute.xlu0 %154  ;;  %v169_v43 = vpop.permute.xlu1 %168 }
  0x79   :  { %v186_v44 = vsel %vm185_vm7, %v181_v42, %v169_v43  ;;  %v182_v47 = vsel %vm180_vm6, %v113_v25, %v155_v41 }
  0x7a   :  { %2112 = vmatprep.mubr.msk.f32.mxu1 %vm207_vm8, %v186_v44 }
  0x7c   :  { %v157_v46 = vpop.permute.xlu0 %156  ;;  %v171_v49 = vpop.permute.xlu1 %170 }
  0x7d   :  { %v187_v50 = vsel %vm185_vm7, %v182_v47, %v171_v49  ;;  %v183_v51 = vsel %vm180_vm6, %v125_v48, %v157_v46 }
  0x7e   :  { %2113 = vmatmul.mubr.msk.f32.vlgmr.msra.gmra.mrb[0].mxu1 %vm207_vm8, %v187_v50 }
  0x80   :  { %v173_v52 = vpop.permute.xlu0 %172  ;;  %v175_v55 = vpop.permute.xlu1 %174 }
  0x81   :  { %v188_v54 = vsel %vm185_vm7, %v183_v51, %v173_v52  ;;  %v189_v56 = vsel %vm185_vm7, %v184_v53, %v175_v55  ;;  %v2407_v55 = vld [vmem:[%s3136_s5] ss:$8 sps:$4 sm:$0xff]  }
  0x82   :  { %2115 = vmatprep.mubr.msk.f32.mxu1 %vm207_vm8, %v188_v54  ;;  %v2405_v54 = vld [vmem:[%s3136_s5 + $0x4] ss:$8 sps:$4 sm:$0xff]  }
  0x83   :  { %2116 = vmatmul.mubr.msk.f32.gmra.mrb[2].mxu1 %vm207_vm8, %v189_v56  ;;  %v2408_v56 = vld [vmem:[%s3136_s5 + $0x14] ss:$8 sps:$4 sm:$0xff]   ;;  %2192 = vmatprep.subr.bf16.mxu0 %v2405_v54 }
 0x151   :  { %v2114_v0 = vpop.f32.mrb[0].mxu1 }
 0x152   :  { %v296_v1 = vadd.f32 %v2114_v0, %v1514_v63  ;;  %v290_v2 = vpop.f32.mrb[1].mxu1  ;;  %v2420_v0 = vld [vmem:[%s3136_s5 + $0x54] ss:$8 sps:$4 sm:$0xff]  }
 0x153   :  { %v291_v4 = vadd.f32 %v1514_v63, %v290_v2  ;;  %v2423_v2 = vld [vmem:[%s3136_s5 + $0x64] ss:$8 sps:$4 sm:$0xff]  }
 0x154   :  { %v310_v5 = vmax.f32 %v296_v1, 0.0  ;;  %v2422_v1 = vld [vmem:[%s3136_s5 + $0x50] ss:$8 sps:$4 sm:$0xff]  }
 0x155   :  { %v309_v6 = vmax.f32 %v291_v4, 0.0  ;;  %v2425_v4 = vld [vmem:[%s3136_s5 + $0x60] ss:$8 sps:$4 sm:$0xff]  }
 0x156   :  { %v2117_v7 = vpop.f32.mrb[2].mxu1  ;;  %v314_v8 = vrot.slane %v310_v5, 7  ;;  %v326_v10 = vrot.slane %v310_v5, 1  ;;  %343 = vrot.lane.b32.xlu1 %v310_v5, %s2467_s13  ;;  %v2426_v5 = vld [vmem:[%s3136_s5 + $0x74] ss:$8 sps:$4 sm:$0xff]  }
 0x157   :  { %v306_v11 = vadd.f32 %v2117_v7, %v1514_v63  ;;  %v300_v12 = vpop.f32.mrb[3].mxu1  ;;  %v313_v13 = vrot.slane %v309_v6, 7  ;;  %v325_v14 = vrot.slane %v309_v6, 1  ;;  %341 = vrot.lane.b32.xlu0 %v309_v6, %s2467_s13  ;;  %v2428_v6 = vld [vmem:[%s3136_s5 + $0x70] ss:$8 sps:$4 sm:$0xff]  }
 0x158   :  { %v301_v15 = vadd.f32 %v1514_v63, %v300_v12  ;;  %v2419_v63 = vld [vmem:[%s3136_s5 + $0x40] ss:$8 sps:$4 sm:$0xff]   ;;  %v2429_v7 = vld [vmem:[%s3136_s5 + $0x84] ss:$8 sps:$4 sm:$0xff]  }
 0x159   :  { %v312_v16 = vmax.f32 %v306_v11, 0.0  ;;  %v331_v18 = vsel %vm131_vm0, %v325_v14, %v326_v10  ;;  %v319_v19 = vsel %vm110_vm1, %v313_v13, %v314_v8  ;;  %v2434_v11 = vld [vmem:[%s3136_s5 + $0x90] ss:$8 sps:$4 sm:$0xff]   ;;  %v2435_v12 = vld [vmem:[%s3136_s5 + $0xa4] ss:$8 sps:$4 sm:$0xff]  }
 0x15a   :  { %v311_v17 = vmax.f32 %v301_v15, 0.0  ;;  %v2440_v15 = vld [vmem:[%s3136_s5 + $0xb0] ss:$8 sps:$4 sm:$0xff]  }
 0x15b   :  { %v316_v20 = vrot.slane %v312_v16, 7  ;;  %v328_v21 = vrot.slane %v312_v16, 1  ;;  %357 = vrot.lane.b32.xlu0 %v331_v18, %s2468_s2 }
 0x15c   :  { %v315_v22 = vrot.slane %v311_v17, 7  ;;  %v327_v23 = vrot.slane %v311_v17, 1 }
 0x15d   :  { %v332_v24 = vsel %vm131_vm0, %v328_v21, %v325_v14  ;;  %v320_v25 = vsel %vm110_vm1, %v316_v20, %v313_v13  ;;  %v2437_v13 = vld [vmem:[%s3136_s5 + $0xa0] ss:$8 sps:$4 sm:$0xff]   ;;  %v2438_v14 = vld [vmem:[%s3136_s5 + $0xb4] ss:$8 sps:$4 sm:$0xff]  }
 0x15e   :  { %v330_v28 = vsel %vm131_vm0, %v326_v10, %v327_v23  ;;  %v329_v29 = vsel %vm131_vm0, %v327_v23, %v328_v21  ;;  %v318_v31 = vsel %vm110_vm1, %v314_v8, %v315_v22  ;;  %v317_v32 = vsel %vm110_vm1, %v315_v22, %v316_v20  ;;  %v2431_v8 = vld [vmem:[%s3136_s5 + $0x80] ss:$8 sps:$4 sm:$0xff]   ;;  %v2432_v10 = vld [vmem:[%s3136_s5 + $0x94] ss:$8 sps:$4 sm:$0xff]  }
 0x15f   :  { %v334_v30 = vsel %vm2579_vm3, %v330_v28, 0.0  ;;  %345 = vrot.lane.b32.xlu0 %v311_v17, %s2467_s13  ;;  %v336_v33 = vsel %vm2583_vm4, %v332_v24, 0.0  ;;  %v321_v35 = vsel %vm2600_vm5, %v320_v25, 0.0  ;;  %v323_v46 = vsel %vm2608_vm9, %v318_v31, 0.0  ;;  %v1573_v31 = vld [vmem:[%s3138_s7] sm:$0xff]  }
 0x160   :  { %359 = vrot.lane.b32.xlu1 %v334_v30, %s2468_s2  ;;  %v1841_v30 = vld [vmem:[%s3138_s7 + $0x40] sm:$0xff]  }
 0x161   :  { %2240 = vmatprep.subr.bf16.mxu1 %v1841_v30  ;;  %v1839_v30 = vld [vmem:[%s3138_s7 + $0x30] sm:$0xff]  }
 0x162   :  { %2242 = vmatpush3.bf16.msra.mxu1 %v1573_v31  ;;  %v1848_v31 = vld [vmem:[%s3138_s7 + $0x78] sm:$0xff]  }
 0x163   :  { %361 = vrot.lane.b32.xlu0 %v329_v29, %s2468_s2  ;;  %v1873_v29 = vld [vmem:[%s3138_s7 + $0x140] sm:$0xff]  }
 0x164   :  { %347 = vrot.lane.b32.xlu1 %v312_v16, %s2467_s13  ;;  %v1520_v16 = vld [vmem:[%s3135_s4] ss:$0 sm:$0xff] }
 0x168   :  { %363 = vrot.lane.b32.xlu1 %v336_v33, %s2468_s2 }
 0x1c8   :  { %v344_v37 = vpop.permute.xlu1 %343 }
 0x1c9   :  { %v342_v34 = vpop.permute.xlu0 %341  ;;  %v371_v41 = vsel %vm369_vm10, %v319_v19, %v344_v37 }
 0x1ca   :  { %v370_v38 = vsel %vm369_vm10, %v321_v35, %v342_v34  ;;  %v1842_v35 = vld [vmem:[%s3138_s7 + $0x48] sm:$0xff]  }
 0x1cb   :  { %2244 = vmatprep.subr.bf16.mxu1 %v1842_v35  ;;  %v628_v35 = vld [vmem:[%s3137_s6] sm:$0x3] }
 0x1cd   :  { %v358_v39 = vpop.permute.xlu0 %357 }
 0x1ce   :  { %v375_v40 = vsel %vm374_vm11, %v370_v38, %v358_v39 }
 0x1cf   :  { %2142 = vmatprep.mubr.msk.f32.mxu0 %vm410_vm12, %v375_v40  ;;  %v1834_v40 = vld [vmem:[%s3138_s7 + $0x8] sm:$0xff]  }
 0x1d0   :  { %2246 = vmatpush3.bf16.msra.mxu1 %v1834_v40 }
 0x1d1   :  { %v346_v43 = vpop.permute.xlu0 %345 }
 0x1d2   :  { %v360_v42 = vpop.permute.xlu1 %359  ;;  %v372_v47 = vsel %vm369_vm10, %v323_v46, %v346_v43 }
 0x1d3   :  { %v376_v44 = vsel %vm374_vm11, %v371_v41, %v360_v42  ;;  %v1843_v42 = vld [vmem:[%s3138_s7 + $0x50] sm:$0xff]  }
 0x1d4   :  { %2143 = vmatmul.mubr.msk.f32.vlgmr.msra.gmra.mrb[0].mxu0 %vm410_vm12, %v376_v44  ;;  %2248 = vmatprep.subr.bf16.mxu1 %v1843_v42 }
 0x1d5   :  { %v362_v49 = vpop.permute.xlu0 %361  ;;  %2194 = vmatpush1.bf16.msra.mxu0 %v2407_v55 }
 0x1d6   :  { %v348_v48 = vpop.permute.xlu1 %347  ;;  %v377_v50 = vsel %vm374_vm11, %v372_v47, %v362_v49  ;;  %2196 = vmatprep.subr.bf16.mxu0 %v2408_v56  ;;  %v1835_v49 = vld [vmem:[%s3138_s7 + $0x10] sm:$0xff]  }
 0x1d7   :  { %2145 = vmatprep.mubr.msk.f32.mxu0 %vm410_vm12, %v377_v50  ;;  %v373_v51 = vsel %vm369_vm10, %v317_v32, %v348_v48  ;;  %2250 = vmatpush3.bf16.msra.mxu1 %v1835_v49 }
 0x1d9   :  { %2198 = vmatpush1.bf16.msra.mxu0 %v2410_v57 }
 0x1da   :  { %v364_v52 = vpop.permute.xlu1 %363  ;;  %2200 = vmatprep.subr.bf16.mxu0 %v2411_v58  ;;  %v1865_v58 = vld [vmem:[%s3138_s7 + $0x100] sm:$0xff]  }
 0x1db   :  { %v378_v53 = vsel %vm374_vm11, %v373_v51, %v364_v52 }
 0x1dc   :  { %2146 = vmatmul.mubr.msk.f32.gmra.mrb[2].mxu0 %vm410_vm12, %v378_v53 }
 0x1dd   :  { %2202 = vmatpush1.bf16.msra.mxu0 %v2413_v59 }
 0x1de   :  { %2204 = vmatprep.subr.bf16.mxu0 %v2414_v60  ;;  %v1874_v60 = vld [vmem:[%s3138_s7 + $0x148] sm:$0xff]  }
 0x1e1   :  { %2206 = vmatpush1.bf16.msra.mxu0 %v2416_v61 }
 0x1e2   :  { %2208 = vmatprep.subr.bf16.mxu0 %v2417_v62 }
 0x1e5   :  { %2210 = vmatpush1.bf16.msra.mxu0 %v2419_v63  ;;  %v1866_v63 = vld [vmem:[%s3138_s7 + $0x108] sm:$0xff]  }
 0x1e6   :  { %2212 = vmatprep.subr.bf16.mxu0 %v2420_v0 }
 0x1e9   :  { %2214 = vmatpush1.bf16.msra.mxu0 %v2422_v1  ;;  %v1875_v1 = vld [vmem:[%s3138_s7 + $0x150] sm:$0xff]  }
 0x1ea   :  { %2216 = vmatprep.subr.bf16.mxu0 %v2423_v2 }
 0x1ed   :  { %2218 = vmatpush1.bf16.msra.mxu0 %v2425_v4 }
 0x1ee   :  { %2220 = vmatprep.subr.bf16.mxu0 %v2426_v5  ;;  %v1867_v5 = vld [vmem:[%s3138_s7 + $0x110] sm:$0xff]  }
 0x1f1   :  { %2222 = vmatpush1.bf16.msra.mxu0 %v2428_v6 }
 0x1f2   :  { %2224 = vmatprep.subr.bf16.mxu0 %v2429_v7  ;;  %v1876_v7 = vld [vmem:[%s3138_s7 + $0x158] sm:$0xff]  }
 0x1f5   :  { %2226 = vmatpush1.bf16.msra.mxu0 %v2431_v8 }
 0x1f6   :  { %2228 = vmatprep.subr.bf16.mxu0 %v2432_v10 }
 0x1f9   :  { %2230 = vmatpush1.bf16.msra.mxu0 %v2434_v11  ;;  %v1868_v11 = vld [vmem:[%s3138_s7 + $0x118] sm:$0xff]  }
 0x1fa   :  { %2232 = vmatprep.subr.bf16.mxu0 %v2435_v12 }
 0x1fd   :  { %2234 = vmatpush1.bf16.msra.mxu0 %v2437_v13  ;;  %v1877_v13 = vld [vmem:[%s3138_s7 + $0x160] sm:$0xff]  }
 0x1fe   :  { %2236 = vmatprep.subr.bf16.mxu0 %v2438_v14  ;;  %v1869_v14 = vld [vmem:[%s3138_s7 + $0x120] sm:$0xff]  }
 0x201   :  { %2238 = vmatpush1.bf16.msra.mxu0 %v2440_v15  ;;  %v1844_v15 = vld [vmem:[%s3138_s7 + $0x58] sm:$0xff]  }
 0x202   :  { %2304 = vmatprep.subr.bf16.mxu0 %v1873_v29  ;;  %2252 = vmatprep.subr.bf16.mxu1 %v1844_v15  ;;  %v1847_v29 = vld [vmem:[%s3138_s7 + $0x70] sm:$0xff]  }
 0x2a7   :  { %v2144_v17 = vpop.f32.mrb[0].mxu0 }
 0x2a8   :  { %v495_v18 = vadd.f32 %v2144_v17, %v1520_v16  ;;  %v489_v19 = vpop.f32.mrb[1].mxu0  ;;  %v1878_v17 = vld [vmem:[%s3138_s7 + $0x168] sm:$0xff]  }
 0x2a9   :  { %v490_v20 = vadd.f32 %v1520_v16, %v489_v19  ;;  %v1845_v19 = vld [vmem:[%s3138_s7 + $0x60] sm:$0xff]  }
 0x2aa   :  { %v509_v21 = vmax.f32 %v495_v18, 0.0  ;;  %v1870_v18 = vld [vmem:[%s3138_s7 + $0x128] sm:$0xff]  }
 0x2ab   :  { %v508_v22 = vmax.f32 %v490_v20, 0.0  ;;  %v1837_v20 = vld [vmem:[%s3138_s7 + $0x20] sm:$0xff]  }
 0x2ac   :  { %v513_v23 = vrot.slane %v509_v21, 7  ;;  %v525_v24 = vrot.slane %v509_v21, 1  ;;  %542 = vrot.lane.b32.xlu1 %v509_v21, %s2468_s2  ;;  %v1879_v21 = vld [vmem:[%s3138_s7 + $0x170] sm:$0xff]  }
 0x2ad   :  { %v512_v25 = vrot.slane %v508_v22, 7  ;;  %v524_v28 = vrot.slane %v508_v22, 1  ;;  %540 = vrot.lane.b32.xlu0 %v508_v22, %s2468_s2  ;;  %v1871_v22 = vld [vmem:[%s3138_s7 + $0x130] sm:$0xff]  }
 0x2af   :  { %v2147_v32 = vpop.f32.mrb[2].mxu0  ;;  %v530_v33 = vsel %vm131_vm0, %v524_v28, %v525_v24  ;;  %v518_v34 = vsel %vm110_vm1, %v512_v25, %v513_v23 }
 0x2b0   :  { %v505_v37 = vadd.f32 %v2147_v32, %v1520_v16  ;;  %v499_v38 = vpop.f32.mrb[3].mxu0  ;;  %1525 = vmatprep.mubr.msk.f32.mxu0 %vm374_vm11, %v530_v33  ;;  %v1840_v32 = vld [vmem:[%s3138_s7 + $0x38] sm:$0xff]   ;;  %v1857_v33 = vld [vmem:[%s3138_s7 + $0xc0] sm:$0xff]  }
 0x2b1   :  { %v500_v39 = vadd.f32 %v1520_v16, %v499_v38  ;;  %v1836_v16 = vld [vmem:[%s3138_s7 + $0x18] sm:$0xff]  }
 0x2b2   :  { %v511_v41 = vmax.f32 %v505_v37, 0.0  ;;  %2254 = vmatpush3.bf16.msra.mxu1 %v1836_v16  ;;  %v632_v37 = vsub.s32 0, %v2556_v9 }
 0x2b3   :  { %v510_v43 = vmax.f32 %v500_v39, 0.0  ;;  %2256 = vmatprep.subr.bf16.mxu1 %v1845_v19 }
 0x2b4   :  { %v515_v44 = vrot.slane %v511_v41, 7  ;;  %v527_v46 = vrot.slane %v511_v41, 1  ;;  %546 = vrot.lane.b32.xlu1 %v511_v41, %s2468_s2  ;;  %v633_v39 = vrot.slane %v628_v35, %v632_v37  ;;  %v1851_v37 = vld [vmem:[%s3138_s7 + $0x90] sm:$0xff]  }
 0x2b5   :  { %v514_v47 = vrot.slane %v510_v43, 7  ;;  %v526_v48 = vrot.slane %v510_v43, 1  ;;  %544 = vrot.lane.b32.xlu0 %v510_v43, %s2468_s2  ;;  %s2472_s2 = smov [#allocation2]  }
 0x2b6   :  { %v519_v50 = vsel %vm110_vm1, %v515_v44, %v512_v25  ;;  %v531_v51 = vsel %vm131_vm0, %v527_v46, %v524_v28  ;;  %2258 = vmatpush3.bf16.msra.mxu1 %v1837_v20  ;;  %v1880_v25 = vld [vmem:[%s3138_s7 + $0x178] sm:$0xff]   ;;  %s1504_s13 = sshll.u32 %s2472_s2, 4  ;;  %s1505_s13 = int_to_ptr.vmem [resolvable:$true] %s1504_s13 }
 0x2b7   :  { %v529_v52 = vsel %vm131_vm0, %v525_v24, %v526_v48  ;;  %v528_v53 = vsel %vm131_vm0, %v526_v48, %v527_v46  ;;  %v517_v54 = vsel %vm110_vm1, %v513_v23, %v514_v47  ;;  %v516_v55 = vsel %vm110_vm1, %v514_v47, %v515_v44  ;;  %v1846_v23 = vld [vmem:[%s3138_s7 + $0x68] sm:$0xff]   ;;  %v1872_v28 = vld [vmem:[%s3138_s7 + $0x138] sm:$0xff]   ;;  %s2441_s3 = scalar_lea.vmem %s1505_s13, 32  ;;  %p2446_p1 = scmp.lt.s32.totalorder %s1505_s13, %s1505_s13 }
 0x2b8   :  { %v520_v57 = vsel %vm2600_vm5, %v519_v50, 0.0  ;;  %v533_v62 = vsel %vm2579_vm3, %v529_v52, 0.0  ;;  %v522_v4 = vsel %vm2608_vm9, %v517_v54, 0.0  ;;  %v535_v10 = vsel %vm2583_vm4, %v531_v51, 0.0  ;;  %2260 = vmatprep.subr.bf16.mxu1 %v1846_v23  ;;  %v1838_v24 = vld [vmem:[%s3138_s7 + $0x28] sm:$0xff]   ;;  %p2442_p0 = scmp.ne.s32.totalorder %s1505_s13, %s2441_s3  ;;  %p2447_p2 = scmp.lt.s32.totalorder %s2441_s3, %s2441_s3 }
 0x2ba   :  { %2262 = vmatpush3.bf16.msra.mxu1 %v1838_v24  ;;  %v1858_v24 = vld [vmem:[%s3138_s7 + $0xc8] sm:$0xff]   ;;  %p2448_p3 = por %p2447_p2, %p2446_p1 }
 0x2bb   :  { %2264 = vmatprep.subr.bf16.mxu1 %v1847_v29 }
 0x2bc   :  { %p2449_p4 = pnand %p2448_p3, %p2442_p0 }
 0x2be   :  { %2266 = vmatpush3.bf16.msra.mxu1 %v1839_v30 }
 0x2bf   :  { %2268 = vmatprep.subr.bf16.mxu1 %v1848_v31 }
 0x2c2   :  { %2270 = vmatpush3.bf16.msra.mxu1 %v1840_v32 }
 0x2c3   :  { %2272 = vmatprep.subr.bf16.mxu1 %v1857_v33  ;;  %v1859_v33 = vld [vmem:[%s3138_s7 + $0xd0] sm:$0xff]  }
 0x31e   :  { %v543_v61 = vpop.permute.xlu1 %542 }
 0x31f   :  { %v541_v56 = vpop.permute.xlu0 %540  ;;  %v553_v0 = vsel %vm374_vm11, %v518_v34, %v543_v61  ;;  %v636_v34 = vsub.s32 1, %v2556_v9 }
 0x320   :  { %v552_v59 = vsel %vm374_vm11, %v520_v57, %v541_v56 }
 0x321   :  { %717 = vmatmul.mubr.f32.vlgmr.msra.gmra.mrb[4].mxu0 %v552_v59  ;;  %v637_v38 = vrot.slane %v628_v35, %v636_v34 }
 0x322   :  { %1526 = vmatprep.mubr.msk.f32.mxu0 %vm374_vm11, %v533_v62  ;;  %2306 = vmatpush3.bf16.msra.mxu0 %v1865_v58 }
 0x323   :  { %2308 = vmatprep.subr.bf16.mxu0 %v1874_v60 }
 0x325   :  { %723 = vmatmul.mubr.f32.gmra.mrb[6].mxu0 %v553_v0 }
 0x326   :  { %1527 = vmatprep.mubr.msk.f32.mxu0 %vm374_vm11, %v528_v53  ;;  %2310 = vmatpush3.bf16.msra.mxu0 %v1866_v63  ;;  %v547_v8 = vpop.permute.xlu1 %546 }
 0x327   :  { %v545_v2 = vpop.permute.xlu0 %544  ;;  %2312 = vmatprep.subr.bf16.mxu0 %v1875_v1  ;;  %v555_v12 = vsel %vm374_vm11, %v516_v55, %v547_v8 }
 0x328   :  { %v554_v6 = vsel %vm374_vm11, %v522_v4, %v545_v2 }
 0x329   :  { %729 = vmatmul.mubr.f32.gmra.mrb[8].mxu0 %v554_v6 }
 0x32a   :  { %1528 = vmatprep.mubr.msk.f32.mxu0 %vm374_vm11, %v535_v10  ;;  %2314 = vmatpush3.bf16.msra.mxu0 %v1867_v5 }
 0x32b   :  { %2316 = vmatprep.subr.bf16.mxu0 %v1876_v7 }
 0x32d   :  { %735 = vmatmul.mubr.f32.gmra.mrb[10].mxu0 %v555_v12 }
 0x32e   :  { %2318 = vmatpush3.bf16.msra.mxu0 %v1868_v11 }
 0x32f   :  { %2320 = vmatprep.subr.bf16.mxu0 %v1877_v13 }
 0x332   :  { %2322 = vmatpush3.bf16.msra.mxu0 %v1869_v14 }
 0x333   :  { %2324 = vmatprep.subr.bf16.mxu0 %v1878_v17 }
 0x336   :  { %2326 = vmatpush3.bf16.msra.mxu0 %v1870_v18 }
 0x337   :  { %2328 = vmatprep.subr.bf16.mxu0 %v1879_v21 }
 0x33a   :  { %2330 = vmatpush3.bf16.msra.mxu0 %v1871_v22 }
 0x33b   :  { %2332 = vmatprep.subr.bf16.mxu0 %v1880_v25 }
 0x33e   :  { %2334 = vmatpush3.bf16.msra.mxu0 %v1872_v28 }
 0x3f4   :  { %v718_v40 = vpop.f32.mrb[4].mxu0 }
 0x3f5   :  { %v720_v41 = vpop.f32.mrb[5].mxu0  ;;  %v719_v43 = vadd.f32 %v718_v40, %v633_v39  ;;  %v1852_v40 = vld [vmem:[%s3138_s7 + $0x98] sm:$0xff]  }
 0x3f6   :  { %v721_v42 = vadd.f32 %v720_v41, %v637_v38 }
 0x3f7   :  { %v2902_v50 = vmax.f32 %v719_v43, 0.0  ;;  %v1862_v43 = vld [vmem:[%s3138_s7 + $0xe8] sm:$0xff]  }
 0x3f8   :  { %v724_v44 = vpop.f32.mrb[6].mxu0  ;;  %v2900_v48 = vmax.f32 %v721_v42, 0.0  ;;  %v1861_v42 = vld [vmem:[%s3138_s7 + $0xe0] sm:$0xff]  }
 0x3f9   :  { %v725_v46 = vadd.f32 %v724_v44, %v633_v39  ;;  %v726_v47 = vpop.f32.mrb[7].mxu0  ;;  %v773_v60 = vrot.slane %v2902_v50, 1  ;;  %v749_v19 = vrot.slane %v2902_v50, 7  ;;  %v1854_v44 = vld [vmem:[%s3138_s7 + $0xa8] sm:$0xff]  }
 0x3fa   :  { %v727_v49 = vadd.f32 %v726_v47, %v637_v38  ;;  %v774_v58 = vrot.slane %v2900_v48, 1  ;;  %v750_v15 = vrot.slane %v2900_v48, 7  ;;  %v1855_v47 = vld [vmem:[%s3138_s7 + $0xb0] sm:$0xff]  }
 0x3fb   :  { %v2904_v51 = vmax.f32 %v725_v46, 0.0  ;;  %v1863_v46 = vld [vmem:[%s3138_s7 + $0xf0] sm:$0xff]  }
 0x3fc   :  { %v2906_v52 = vmax.f32 %v727_v49, 0.0  ;;  %v730_v53 = vpop.f32.mrb[8].mxu0  ;;  %v1864_v49 = vld [vmem:[%s3138_s7 + $0xf8] sm:$0xff]  }
 0x3fd   :  { %v775_v54 = vrot.slane %v2904_v51, 1  ;;  %v731_v55 = vadd.f32 %v730_v53, %v633_v39  ;;  %v732_v56 = vpop.f32.mrb[9].mxu0  ;;  %v751_v25 = vrot.slane %v2904_v51, 7  ;;  %v1856_v53 = vld [vmem:[%s3138_s7 + $0xb8] sm:$0xff]  }
 0x3fe   :  { %v733_v57 = vadd.f32 %v732_v56, %v637_v38  ;;  %v776_v59 = vrot.slane %v2906_v52, 1  ;;  %v752_v18 = vrot.slane %v2906_v52, 7  ;;  %v1889_v56 = vld [vmem:[%s3140_s9 + $0x48] sm:$0xff]  }
 0x3ff   :  { %v2912_v61 = vmax.f32 %v731_v55, 0.0  ;;  %v785_v4 = vsel %vm131_vm0, %v773_v60, %v775_v54  ;;  %v761_v31 = vsel %vm110_vm1, %v749_v19, %v751_v25  ;;  %v1765_v55 = vld [vmem:[%s3140_s9] sm:$0xff]  }
 0x400   :  { %v2914_v62 = vmax.f32 %v733_v57, 0.0  ;;  %v736_v63 = vpop.f32.mrb[10].mxu0  ;;  %v786_v0 = vsel %vm131_vm0, %v774_v58, %v776_v59  ;;  %v762_v28 = vsel %vm110_vm1, %v750_v15, %v752_v18  ;;  %v1881_v57 = vld [vmem:[%s3140_s9 + $0x8] sm:$0xff]  }
 0x401   :  { %v737_v1 = vadd.f32 %v736_v63, %v633_v39  ;;  %v738_v2 = vpop.f32.mrb[11].mxu0  ;;  %1230 = vmatprep.mubr.f32.mxu0 %v786_v0  ;;  %v777_v5 = vrot.slane %v2912_v61, 1  ;;  %v753_v34 = vrot.slane %v2912_v61, 7  ;;  %v1883_v63 = vld [vmem:[%s3140_s9 + $0x18] sm:$0xff]   ;;  %v1892_v0 = vld [vmem:[%s3140_s9 + $0x60] sm:$0xff]  }
 0x402   :  { %v739_v6 = vadd.f32 %v738_v2, %v637_v38  ;;  %1231 = vmatmul.mubr.f32.vlgmr.msra.gmra.mrb[12].mxu0 %v785_v4  ;;  %v778_v7 = vrot.slane %v2914_v62, 1  ;;  %v754_v29 = vrot.slane %v2914_v62, 7  ;;  %v1893_v2 = vld [vmem:[%s3140_s9 + $0x68] sm:$0xff]  }
 0x403   :  { %v2922_v8 = vmax.f32 %v737_v1, 0.0  ;;  %v783_v13 = vsel %vm131_vm0, %v775_v54, %v777_v5  ;;  %v759_v38 = vsel %vm110_vm1, %v751_v25, %v753_v34  ;;  %v1888_v54 = vld [vmem:[%s3140_s9 + $0x40] sm:$0xff]   ;;  %v1885_v4 = vld [vmem:[%s3140_s9 + $0x28] sm:$0xff]  }
 0x404   :  { %v2924_v10 = vmax.f32 %v739_v6, 0.0  ;;  %v784_v11 = vsel %vm131_vm0, %v776_v59, %v778_v7  ;;  %v760_v35 = vsel %vm110_vm1, %v752_v18, %v754_v29  ;;  %v1882_v59 = vld [vmem:[%s3140_s9 + $0x10] sm:$0xff]   ;;  %v1884_v1 = vld [vmem:[%s3140_s9 + $0x20] sm:$0xff]   ;;  %v1895_v6 = vld [vmem:[%s3140_s9 + $0x78] sm:$0xff]  }
 0x405   :  { %v755_v12 = vrot.slane %v2922_v8, 7  ;;  %1534 = vmatprep.mubr.msk.f32.mxu0 %vm2579_vm3, %v784_v11  ;;  %v779_v14 = vrot.slane %v2922_v8, 1  ;;  %v2469_v11 = vmov 0.0|0.0  }
 0x406   :  { %1535 = vmatmul.mubr.msk.f32.gmra.mrb[14].mxu0 %vm2579_vm3, %v783_v13  ;;  %v756_v16 = vrot.slane %v2924_v10, 7  ;;  %v780_v17 = vrot.slane %v2924_v10, 1  ;;  %2367 = vmatprep.subr.bf16.mxu0 %v2469_v11 }
 0x407   :  { %v763_v22 = vsel %vm110_vm1, %v755_v12, %v749_v19  ;;  %v781_v23 = vsel %vm131_vm0, %v777_v5, %v779_v14  ;;  %v787_v32 = vsel %vm131_vm0, %v779_v14, %v773_v60  ;;  %v757_v41 = vsel %vm110_vm1, %v753_v34, %v755_v12  ;;  %v1891_v60 = vld [vmem:[%s3140_s9 + $0x58] sm:$0xff]   ;;  %v1894_v5 = vld [vmem:[%s3140_s9 + $0x70] sm:$0xff]  }
 0x408   :  { %v764_v20 = vsel %vm110_vm1, %v756_v16, %v750_v15  ;;  %v782_v21 = vsel %vm131_vm0, %v778_v7, %v780_v17  ;;  %v788_v30 = vsel %vm131_vm0, %v780_v17, %v774_v58  ;;  %v758_v39 = vsel %vm110_vm1, %v754_v29, %v756_v16  ;;  %v1890_v58 = vld [vmem:[%s3140_s9 + $0x50] sm:$0xff]   ;;  %v1887_v7 = vld [vmem:[%s3140_s9 + $0x38] sm:$0xff]  }
 0x409   :  { %1530 = vmatprep.mubr.msk.f32.mxu1 %vm2600_vm5, %v764_v20  ;;  %1240 = vmatprep.mubr.f32.mxu0 %v782_v21  ;;  %v2471_v12 = vmov 0.0  }
 0x40a   :  { %1531 = vmatmul.mubr.msk.f32.vlgmr.msra.gmra.mrb[4].mxu1 %vm2600_vm5, %v763_v22  ;;  %1241 = vmatmul.mubr.f32.gmra.mrb[16].mxu0 %v781_v23 }
 0x40b   :  { %2274 = vmatpush3.bf16.msra.mxu1 %v1849_v26  ;;  %1065 = vmatprep.mubr.f32.mxu1 %v762_v28 }
 0x40c   :  { %1536 = vmatprep.mubr.msk.f32.mxu0 %vm2583_vm4, %v788_v30  ;;  %2276 = vmatprep.subr.bf16.mxu1 %v1858_v24 }
 0x40e   :  { %1066 = vmatmul.mubr.f32.gmra.mrb[6].mxu1 %v761_v31  ;;  %1537 = vmatmul.mubr.msk.f32.gmra.mrb[18].mxu0 %vm2583_vm4, %v787_v32 }
 0x40f   :  { %2278 = vmatpush3.bf16.msra.mxu1 %v1850_v36  ;;  %1532 = vmatprep.mubr.msk.f32.mxu1 %vm2608_vm9, %v760_v35  ;;  %v1529_v36 = vld [vmem:[%s3139_s8] ss:$0 sm:$0xff] }
 0x410   :  { %2280 = vmatprep.subr.bf16.mxu1 %v1859_v33  ;;  %2156 = vmatprep.mubr.msk.f32.mxu0 %vm2470_vm13, %v2471_v12 }
 0x412   :  { %1533 = vmatmul.mubr.msk.f32.gmra.mrb[8].mxu1 %vm2608_vm9, %v759_v38 }
 0x413   :  { %2282 = vmatpush3.bf16.msra.mxu1 %v1851_v37  ;;  %1075 = vmatprep.mubr.f32.mxu1 %v758_v39 }
 0x414   :  { %2284 = vmatprep.subr.bf16.mxu1 %v1860_v27 }
 0x416   :  { %1076 = vmatmul.mubr.f32.gmra.mrb[10].mxu1 %v757_v41 }
 0x417   :  { %2286 = vmatpush3.bf16.msra.mxu1 %v1852_v40  ;;  %1145 = vmatprep.mubr.f32.mxu1 %v2900_v48 }
 0x418   :  { %2288 = vmatprep.subr.bf16.mxu1 %v1861_v42 }
 0x41b   :  { %2290 = vmatpush3.bf16.msra.mxu1 %v1853_v45 }
 0x41c   :  { %2292 = vmatprep.subr.bf16.mxu1 %v1862_v43 }
 0x41f   :  { %2294 = vmatpush3.bf16.msra.mxu1 %v1854_v44 }
 0x420   :  { %2296 = vmatprep.subr.bf16.mxu1 %v1863_v46 }
 0x423   :  { %2298 = vmatpush3.bf16.msra.mxu1 %v1855_v47 }
 0x424   :  { %2300 = vmatprep.subr.bf16.mxu1 %v1864_v49 }
 0x427   :  { %2302 = vmatpush3.bf16.msra.mxu1 %v1856_v53 }
 0x428   :  { %2336 = vmatprep.subr.bf16.mxu1 %v1888_v54 }
 0x42a   :  { %1146 = vmatmul.mubr.f32.vlgmr.msra.gmra.mrb[12].mxu1 %v2902_v50 }
 0x42b   :  { %1150 = vmatprep.mubr.f32.mxu1 %v2906_v52  ;;  %2338 = vmatpush3.bf16.msra.mxu1 %v1765_v55 }
 0x42c   :  { %2340 = vmatprep.subr.bf16.mxu1 %v1889_v56 }
 0x42e   :  { %1151 = vmatmul.mubr.f32.gmra.mrb[14].mxu1 %v2904_v51 }
 0x42f   :  { %1155 = vmatprep.mubr.f32.mxu1 %v2914_v62  ;;  %2342 = vmatpush3.bf16.msra.mxu1 %v1881_v57 }
 0x430   :  { %2344 = vmatprep.subr.bf16.mxu1 %v1890_v58 }
 0x432   :  { %1156 = vmatmul.mubr.f32.gmra.mrb[16].mxu1 %v2912_v61 }
 0x433   :  { %1160 = vmatprep.mubr.f32.mxu1 %v2924_v10  ;;  %2346 = vmatpush3.bf16.msra.mxu1 %v1882_v59 }
 0x434   :  { %2348 = vmatprep.subr.bf16.mxu1 %v1891_v60 }
 0x436   :  { %1161 = vmatmul.mubr.f32.gmra.mrb[18].mxu1 %v2922_v8 }
 0x437   :  { %2350 = vmatpush3.bf16.msra.mxu1 %v1883_v63  ;;  %1384 = vmatprep.mubr.f32.mxu1 %v2900_v48  ;;  %v1886_v48 = vld [vmem:[%s3140_s9 + $0x30] sm:$0xff]  }
 0x438   :  { %2352 = vmatprep.subr.bf16.mxu1 %v1892_v0 }
 0x43b   :  { %2354 = vmatpush3.bf16.msra.mxu1 %v1884_v1  ;;  %v1409_v1 = vadd.s32 1, %v2556_v9 }
 0x43c   :  { %2356 = vmatprep.subr.bf16.mxu1 %v1893_v2 }
 0x43f   :  { %2358 = vmatpush3.bf16.msra.mxu1 %v1885_v4 }
 0x440   :  { %2360 = vmatprep.subr.bf16.mxu1 %v1894_v5 }
 0x443   :  { %2362 = vmatpush3.bf16.msra.mxu1 %v1886_v48 }
 0x444   :  { %2364 = vmatprep.subr.bf16.mxu1 %v1895_v6  ;;  %v1406_v6 = vand.u32 127, %v45_v3  ;;  %v1538_v3 = vld [vmem:[%s3141_s10] ss:$0 sm:$0xff] }
 0x447   :  { %2366 = vmatpush3.bf16.msra.mxu1 %v1887_v7  ;;  %v1407_v7 = vmul.u32 16, %v2556_v9 }
 0x449   :  { %vm1408_vm15 = vcmp.ge.s32.totalorder %v1406_v6, %v1407_v7 }
 0x44a   :  { %1385 = vmatmul.mubr.f32.vlgmr.msra.gmra.mrb[20].mxu1 %v2902_v50 }
 0x44b   :  { %1389 = vmatprep.mubr.f32.mxu1 %v2906_v52 }
 0x44e   :  { %1390 = vmatmul.mubr.f32.gmra.mrb[22].mxu1 %v2904_v51 }
 0x44f   :  { %1394 = vmatprep.mubr.f32.mxu1 %v2914_v62 }
 0x452   :  { %1395 = vmatmul.mubr.f32.gmra.mrb[24].mxu1 %v2912_v61 }
 0x453   :  { %1399 = vmatprep.mubr.f32.mxu1 %v2924_v10 }
 0x456   :  { %1400 = vmatmul.mubr.f32.gmra.mrb[26].mxu1 %v2922_v8 }
 0x4d5   :  { %v2041_v50 = vpop.f32.mrb[12].mxu0 }
 0x4d6   :  { %v2042_v13 = vpop.f32.mrb[13].mxu0 }
 0x4d7   :  { %v2043_v52 = vadd.f32 %v2042_v13, %v2041_v50  ;;  %v1410_v50 = vmul.u32 16, %v1409_v1 }
 0x4d9   :  { %v2044_v14 = vpop.f32.mrb[14].mxu0  ;;  %vm1411_vm0 = vcmp.lt.s32.totalorder %v1406_v6, %v1410_v50 }
 0x4da   :  { %v2045_v51 = vpop.f32.mrb[15].mxu0  ;;  %vm1412_vm1 = vmand %vm1408_vm15, %vm1411_vm0 }
 0x4db   :  { %v2046_v15 = vadd.f32 %v2045_v51, %v2044_v14 }
 0x4dd   :  { %v1953_v62 = vpop.f32.mrb[4].mxu1  ;;  %v2047_v16 = vpop.f32.mrb[16].mxu0 }
 0x4de   :  { %v1954_v61 = vpop.f32.mrb[5].mxu1  ;;  %v2048_v17 = vpop.f32.mrb[17].mxu0 }
 0x4df   :  { %v1955_v10 = vadd.f32 %v1954_v61, %v1953_v62  ;;  %v2049_v18 = vadd.f32 %v2048_v17, %v2047_v16  ;;  %v1413_v16 = vsel %vm1412_vm1, 0.0625, %v2471_v12 }
 0x4e1   :  { %v1956_v8 = vpop.f32.mrb[6].mxu1  ;;  %v2050_v19 = vpop.f32.mrb[18].mxu0  ;;  %v1063_v33 = vadd.f32 %v1955_v10, %v1529_v36 }
 0x4e2   :  { %v1957_v20 = vpop.f32.mrb[7].mxu1  ;;  %v2051_v21 = vpop.f32.mrb[19].mxu0 }
 0x4e3   :  { %v1958_v26 = vadd.f32 %v1957_v20, %v1956_v8  ;;  %v2052_v22 = vadd.f32 %v2051_v21, %v2050_v19 }
 0x4e5   :  { %v1959_v23 = vpop.f32.mrb[8].mxu1  ;;  %v1068_v27 = vadd.f32 %v1958_v26, %v1529_v36 }
 0x4e6   :  { %v1960_v24 = vpop.f32.mrb[9].mxu1 }
 0x4e7   :  { %v1961_v25 = vadd.f32 %v1960_v24, %v1959_v23 }
 0x4e9   :  { %v1962_v28 = vpop.f32.mrb[10].mxu1  ;;  %v1073_v43 = vadd.f32 %v1961_v25, %v1529_v36 }
 0x4ea   :  { %v1963_v29 = vpop.f32.mrb[11].mxu1 }
 0x4eb   :  { %v1964_v30 = vadd.f32 %v1963_v29, %v1962_v28 }
 0x4ed   :  { %v1078_v54 = vadd.f32 %v1964_v30, %v1529_v36 }
 0x4fd   :  { %v1997_v31 = vpop.f32.mrb[12].mxu1 }
 0x4fe   :  { %v1998_v32 = vpop.f32.mrb[13].mxu1 }
 0x4ff   :  { %v1999_v34 = vadd.f32 %v1998_v32, %v1997_v31 }
 0x501   :  { %v1148_v35 = vadd.f32 %v1999_v34, %v1063_v33  ;;  %v2000_v37 = vpop.f32.mrb[14].mxu1 }
 0x502   :  { %v2001_v38 = vpop.f32.mrb[15].mxu1 }
 0x503   :  { %v1233_v39 = vadd.f32 %v2043_v52, %v1148_v35  ;;  %v2002_v40 = vadd.f32 %v2001_v38, %v2000_v37 }
 0x505   :  { %1252 = vst.msk [vmem:[%s3142_s11] sm:$0xff] %vm1251_vm14, %v1233_v39  ;;  %v1153_v41 = vadd.f32 %v2002_v40, %v1068_v27  ;;  %v2003_v42 = vpop.f32.mrb[16].mxu1 }
 0x506   :  { %v2004_v45 = vpop.f32.mrb[17].mxu1 }
 0x507   :  { %v1238_v44 = vadd.f32 %v2046_v15, %v1153_v41  ;;  %v2005_v46 = vadd.f32 %v2004_v45, %v2003_v42 }
 0x509   :  { %1253 = vst.msk [vmem:[%s3142_s11 + $0x8] sm:$0xff] %vm1251_vm14, %v1238_v44  ;;  %v1158_v47 = vadd.f32 %v2005_v46, %v1073_v43  ;;  %v2006_v49 = vpop.f32.mrb[18].mxu1 }
 0x50a   :  { %v2007_v53 = vpop.f32.mrb[19].mxu1 }
 0x50b   :  { %v1243_v55 = vadd.f32 %v2049_v18, %v1158_v47  ;;  %v2008_v56 = vadd.f32 %v2007_v53, %v2006_v49 }
 0x50d   :  { %1254 = vst.msk [vmem:[%s3142_s11 + $0x10] sm:$0xff] %vm1251_vm14, %v1243_v55  ;;  %v1163_v57 = vadd.f32 %v2008_v56, %v1078_v54 }
 0x50f   :  { %v1248_v58 = vadd.f32 %v2052_v22, %v1163_v57 }
 0x511   :  { %1255 = vst.msk [vmem:[%s3142_s11 + $0x18] sm:$0xff] %vm1251_vm14, %v1248_v58 }
 0x51d   :  { %v2085_v59 = vpop.f32.mrb[20].mxu1 }
 0x51e   :  { %v2086_v60 = vpop.f32.mrb[21].mxu1 }
 0x51f   :  { %v2087_v63 = vadd.f32 %v2086_v60, %v2085_v59 }
 0x521   :  { %v2088_v0 = vpop.f32.mrb[22].mxu1 }
 0x522   :  { %v2089_v2 = vpop.f32.mrb[23].mxu1 }
 0x523   :  { %v2090_v4 = vadd.f32 %v2089_v2, %v2088_v0 }
 0x525   :  { %v2368_v5 = vpack.c.bf16 %v2090_v4, %v2087_v63  ;;  %v2091_v48 = vpop.f32.mrb[24].mxu1 }
 0x526   :  { %v2092_v13 = vpop.f32.mrb[25].mxu1 }
 0x527   :  { %v2093_v52 = vadd.f32 %v2092_v13, %v2091_v48  ;;  %2369 = vmatpush3.bf16.msra.mxu0 %v2368_v5 }
 0x528   :  { %2370 = vmatprep.subr.bf16.mxu0 %v2469_v11 }
 0x529   :  { %v2094_v14 = vpop.f32.mrb[26].mxu1 }
 0x52a   :  { %v2095_v51 = vpop.f32.mrb[27].mxu1 }
 0x52b   :  { %v2096_v15 = vadd.f32 %v2095_v51, %v2094_v14 }
 0x52d   :  { %v2371_v62 = vpack.c.bf16 %v2096_v15, %v2093_v52 }
 0x52f   :  { %2372 = vmatpush3.bf16.msra.mxu0 %v2371_v62 }
 0x532   :  { %2157 = vmatmul.mubr.msk.f32.vlgmr.msra.gmra.mrb[20].mxu0 %vm369_vm10, %v1413_v16 }
 0x605   :  { %v1490_v9 = vpop.f32.mrb[20].mxu0 }
 0x606   :  { %v1491_v11 = vadd.f32 %v1538_v3, %v1490_v9  ;;  %v2158_v61 = vpop.f32.mrb[21].mxu0 }
 0x608   :  { %1495 = vst.msk [vmem:[#allocation2] sm:$0x3] %vm1494_vm2, %v1491_v11 }
 0x609   :  { %2452 = shalt.err (!%p2449_p4)
}
 0x60a   :  { %s2453_s0 = scalar_lea.hbm %s3143_s12, 32 }
 0x60b   :  { %p2454_p5 = scmp.ne.s32.totalorder %s3143_s12, %s2453_s0  ;;  %p2457_p6 = scmp.lt.u32.totalorder %s2453_s0, %s3143_s12 }
 0x60d   :  { %p2459_p7 = pnand %p2457_p6, %p2454_p5 }
 0x60f   :  { %2462 = shalt.err (!%p2459_p7)
}
 0x610   :  { %1507 = dma.vmem_to_hbm [thread:$0]  %s1505_s13, 32, %s3143_s12, [#allocation3]  }
 0x611   :  { %2463 = dma.done.wait [#allocation3], 32  }
 0x612   :  { %2464 = vsyncadd [#allocation3], 4294967264 }
 0x613   :  { %1513 = vsyncpa [#allocation3], 1 }

</bundles_post_ra>
